<compile_context>
chip_gen: v7x
topology: tpu7x:2x2x1
jax: 0.10.0
libtpu: 0.0.40
codegen_flags: <defaults>
</compile_context>

<pallas_src>
import functools

import jax
import jax.numpy as jnp
from jax.experimental import pallas as pl
from jax.experimental.pallas import tpu as pltpu


def _convtranspose_bn_silu_kernel(x_ref, w_ref, b_ref, o_ref, *, c1, rows, hw, nb):
    """One grid step = `nb` batch elements.

    x_ref : (nb, C1, HW)   input in natural layout, HW = H*W (lanes = spatial)
    w_ref : (C1, R, 1)     BN-folded weight columns, R = C2*k*k (rows = co,di,dj)
    b_ref : (R, 1)         BN-folded per-row bias
    o_ref : (nb, R, HW)    out[b, co*k*k + di*k + dj, i*W + j]   (lane-dense)
    """
    # Hoisted broadcasts: built exactly once per grid step (JAX does not CSE
    # broadcast_in_dim).  Weight columns are lane-splats of (R, 1); bias too.
    w_cols = [jnp.broadcast_to(w_ref[c], (rows, hw)) for c in range(c1)]
    bias_b = jnp.broadcast_to(b_ref[...], (rows, hw))

    for b in range(nb):                               # static unroll, nb small
        # Sublane-broadcast each input-channel row (1, HW) -> (R, HW).
        x_rows = [jnp.broadcast_to(x_ref[b, pl.ds(c, 1), :], (rows, hw))
                  for c in range(c1)]
        acc = w_cols[0] * x_rows[0]                   # C1 unrolled VPU FMAs
        for c in range(1, c1):
            acc = acc + w_cols[c] * x_rows[c]
        z = acc + bias_b                              # BN (scale folded into W)
        # SiLU: exp and reciprocal on the EUP slot; VALU only does the adds/muls.
        o_ref[b] = z * pl.reciprocal(1.0 + jnp.exp(-z), approx=False)


def _pick_batch_block(n, max_block=8):
    """Largest divisor of n (capped) that keeps >= 2 grid steps when n >= 2,
    so both v7x TensorCores stay busy while per-step overhead is amortized."""
    if n < 2:
        return 1
    target = max(1, min(max_block, n // 2))
    for nb in range(target, 0, -1):
        if n % nb == 0:
            return nb
    return 1


def conv_transpose(x_nchw, w_ct, bn, k=2, s=2, p=0, eps=1e-5):
    """ConvTranspose2d(c1, c2, k, s, p, bias=False) + BatchNorm2d + SiLU.

    x_nchw : (N, C1, H, W)     float32 input (PyTorch NCHW layout)
    w_ct   : (C1, C2, k, k)    ConvTranspose2d weight (PyTorch layout)
    bn     : (gamma, beta, running_mean, running_var), each (C2,)
    returns (N, C2, k*H, k*W)
    """
    N, C1, H, W = x_nchw.shape
    _, C2, kh, kw = w_ct.shape
    assert kh == k and kw == k and s == k and p == 0, (
        "kernel specialized to the module default k == s, p == 0")
    HW = H * W
    R = C2 * k * k
    nb = _pick_batch_block(N)

    gamma, beta, mean, var = bn
    scale = (gamma / jnp.sqrt(var + eps)).astype(jnp.float32)        # (C2,)
    bias = (beta - mean * scale).astype(jnp.float32)                 # (C2,)

    # ---- parameter-side prep (one tiny fusion; BN scale folded into W) ----
    wf = w_ct.astype(jnp.float32) * scale[None, :, None, None]       # (C1, C2, k, k)
    w_cols = wf.reshape(C1, R, 1)                                    # row r = co*k*k + di*k + dj
    b_col = jnp.broadcast_to(bias[:, None], (C2, k * k)).reshape(R, 1)

    # Free (bitcast) reshape of the activation -- nothing is materialized.
    x2 = x_nchw.astype(jnp.float32).reshape(N, C1, HW)

    kernel = functools.partial(_convtranspose_bn_silu_kernel,
                               c1=C1, rows=R, hw=HW, nb=nb)

    out_rows = pl.pallas_call(
        kernel,
        out_shape=jax.ShapeDtypeStruct((N, R, HW), jnp.float32),
        grid_spec=pltpu.PrefetchScalarGridSpec(
            num_scalar_prefetch=0,
            grid=(N // nb,),
            in_specs=[
                pl.BlockSpec((nb, C1, HW), lambda n: (n, 0, 0)),
                pl.BlockSpec((C1, R, 1), lambda n: (0, 0, 0)),
                pl.BlockSpec((R, 1), lambda n: (0, 0)),
            ],
            out_specs=pl.BlockSpec((nb, R, HW), lambda n: (n, 0, 0)),
        ),
        compiler_params=pltpu.CompilerParams(
            dimension_semantics=("parallel",)),
    )(x2, w_cols, b_col)

    # ---- NCHW tap interleave: (n, co, di, dj, i, j) -> (n, co, i, di, j, dj) ----
    # TODO(synk): a consumer that accepts the (N, C2*k*k, H*W) row layout (or
    # NHWC) could take `out_rows` directly and skip this small transpose op.
    out = out_rows.reshape(N, C2, k, k, H, W)
    out = jnp.transpose(out, (0, 1, 4, 2, 5, 3)).reshape(N, C2, k * H, k * W)
    return out


def _reference(x_nchw, w_ct, bn, k=2, eps=1e-5):
    """Pure-JAX reference: ConvTranspose2d(k=s, p=0) + inference-mode BN + SiLU."""
    N, C1, H, W = x_nchw.shape
    C2 = w_ct.shape[1]
    y = jnp.einsum('ncij,coab->noiajb', x_nchw, w_ct).reshape(N, C2, k * H, k * W)
    gamma, beta, mean, var = bn
    inv = 1.0 / jnp.sqrt(var + eps)
    y = (y - mean[None, :, None, None]) * (gamma * inv)[None, :, None, None] \
        + beta[None, :, None, None]
    return y * jax.nn.sigmoid(y)                    # SiLU


if __name__ == "__main__":
    # Small shapes consistent with the module defaults: N=2, c1=4, c2=8, H=W=16, k=s=2.
    N, C1, C2, H, W, K, STRIDE = 2, 4, 8, 16, 16, 2, 2

    key = jax.random.PRNGKey(0)
    kx, kw, kg, kb, km, kv = jax.random.split(key, 6)

    x = jax.random.normal(kx, (N, C1, H, W), dtype=jnp.float32)

    # Deterministic synthetic parameters (not a checkpoint load).
    w_ct = jax.random.normal(kw, (C1, C2, K, K), dtype=jnp.float32) * 0.1
    bn = (1.0 + 0.1 * jax.random.normal(kg, (C2,), dtype=jnp.float32),   # gamma
          0.1 * jax.random.normal(kb, (C2,), dtype=jnp.float32),         # beta
          0.1 * jax.random.normal(km, (C2,), dtype=jnp.float32),         # running_mean
          0.5 + jax.random.uniform(kv, (C2,), dtype=jnp.float32))        # running_var

    out = conv_transpose(x, w_ct, bn, k=K, s=STRIDE, p=0)
    out = jax.block_until_ready(out)

    ref = _reference(x, w_ct, bn, k=K)
    assert out.shape == (N, C2, K * H, K * W), out.shape
    assert jnp.allclose(out, ref, atol=1e-4, rtol=1e-4), "mismatch vs reference"

    print("KERNEL_OK")
</pallas_src>

<mosaic_0001>
module attributes {stable_mosaic.version = 11 : i64} {
  func.func @_convtranspose_bn_silu_kernel(%arg0: i32, %arg1: memref<1x4x256xf32, #tpu.memory_space<vmem>>, %arg2: memref<4x32x1xf32, #tpu.memory_space<vmem>>, %arg3: memref<32x1xf32, #tpu.memory_space<vmem>>, %arg4: memref<1x32x256xf32, #tpu.memory_space<vmem>>) attributes {dimension_semantics = [#tpu.dimension_semantics<parallel>], iteration_bounds = array<i64: 2>, scalar_prefetch = 0 : i64, scratch_operands = 0 : i64, tpu.core_type = #tpu.core_type<tc>, window_params = [{transform_indices = @transform_0, window_bounds = array<i64: 1, 4, 256>}, {pipeline_mode = #tpu.pipeline_mode<synchronous>, transform_indices = @transform_1, window_bounds = array<i64: 4, 32, 1>}, {pipeline_mode = #tpu.pipeline_mode<synchronous>, transform_indices = @transform_2, window_bounds = array<i64: 32, 1>}, {transform_indices = @transform_3, window_bounds = array<i64: 1, 32, 256>}]} {
    %c0 = arith.constant 0 : index
    %c0_0 = arith.constant 0 : index
    %c0_1 = arith.constant 0 : index
    %0 = vector.load %arg2[%c0, %c0_0, %c0_1] : memref<4x32x1xf32, #tpu.memory_space<vmem>>, vector<1x32x1xf32>
    %1 = vector.shape_cast %0 : vector<1x32x1xf32> to vector<32x1xf32>
    %2 = vector.shape_cast %1 : vector<32x1xf32> to vector<32x1xf32>
    %3 = vector.broadcast %2 : vector<32x1xf32> to vector<32x256xf32>
    %c1 = arith.constant 1 : index
    %c0_2 = arith.constant 0 : index
    %c0_3 = arith.constant 0 : index
    %4 = vector.load %arg2[%c1, %c0_2, %c0_3] : memref<4x32x1xf32, #tpu.memory_space<vmem>>, vector<1x32x1xf32>
    %5 = vector.shape_cast %4 : vector<1x32x1xf32> to vector<32x1xf32>
    %6 = vector.shape_cast %5 : vector<32x1xf32> to vector<32x1xf32>
    %7 = vector.broadcast %6 : vector<32x1xf32> to vector<32x256xf32>
    %c2 = arith.constant 2 : index
    %c0_4 = arith.constant 0 : index
    %c0_5 = arith.constant 0 : index
    %8 = vector.load %arg2[%c2, %c0_4, %c0_5] : memref<4x32x1xf32, #tpu.memory_space<vmem>>, vector<1x32x1xf32>
    %9 = vector.shape_cast %8 : vector<1x32x1xf32> to vector<32x1xf32>
    %10 = vector.shape_cast %9 : vector<32x1xf32> to vector<32x1xf32>
    %11 = vector.broadcast %10 : vector<32x1xf32> to vector<32x256xf32>
    %c3 = arith.constant 3 : index
    %c0_6 = arith.constant 0 : index
    %c0_7 = arith.constant 0 : index
    %12 = vector.load %arg2[%c3, %c0_6, %c0_7] : memref<4x32x1xf32, #tpu.memory_space<vmem>>, vector<1x32x1xf32>
    %13 = vector.shape_cast %12 : vector<1x32x1xf32> to vector<32x1xf32>
    %14 = vector.shape_cast %13 : vector<32x1xf32> to vector<32x1xf32>
    %15 = vector.broadcast %14 : vector<32x1xf32> to vector<32x256xf32>
    %c0_8 = arith.constant 0 : index
    %c0_9 = arith.constant 0 : index
    %16 = vector.load %arg3[%c0_8, %c0_9] : memref<32x1xf32, #tpu.memory_space<vmem>>, vector<32x1xf32>
    %17 = vector.shape_cast %16 : vector<32x1xf32> to vector<32x1xf32>
    %18 = vector.broadcast %17 : vector<32x1xf32> to vector<32x256xf32>
    %c0_10 = arith.constant 0 : index
    %c0_11 = arith.constant 0 : index
    %c0_12 = arith.constant 0 : index
    %19 = vector.load %arg1[%c0_10, %c0_11, %c0_12] : memref<1x4x256xf32, #tpu.memory_space<vmem>>, vector<1x1x256xf32>
    %20 = vector.shape_cast %19 : vector<1x1x256xf32> to vector<1x256xf32>
    %21 = vector.shape_cast %20 : vector<1x256xf32> to vector<1x256xf32>
    %22 = vector.broadcast %21 : vector<1x256xf32> to vector<32x256xf32>
    %c0_13 = arith.constant 0 : index
    %c1_14 = arith.constant 1 : index
    %c0_15 = arith.constant 0 : index
    %23 = vector.load %arg1[%c0_13, %c1_14, %c0_15] : memref<1x4x256xf32, #tpu.memory_space<vmem>>, vector<1x1x256xf32>
    %24 = vector.shape_cast %23 : vector<1x1x256xf32> to vector<1x256xf32>
    %25 = vector.shape_cast %24 : vector<1x256xf32> to vector<1x256xf32>
    %26 = vector.broadcast %25 : vector<1x256xf32> to vector<32x256xf32>
    %c0_16 = arith.constant 0 : index
    %c2_17 = arith.constant 2 : index
    %c0_18 = arith.constant 0 : index
    %27 = vector.load %arg1[%c0_16, %c2_17, %c0_18] : memref<1x4x256xf32, #tpu.memory_space<vmem>>, vector<1x1x256xf32>
    %28 = vector.shape_cast %27 : vector<1x1x256xf32> to vector<1x256xf32>
    %29 = vector.shape_cast %28 : vector<1x256xf32> to vector<1x256xf32>
    %30 = vector.broadcast %29 : vector<1x256xf32> to vector<32x256xf32>
    %c0_19 = arith.constant 0 : index
    %c3_20 = arith.constant 3 : index
    %c0_21 = arith.constant 0 : index
    %31 = vector.load %arg1[%c0_19, %c3_20, %c0_21] : memref<1x4x256xf32, #tpu.memory_space<vmem>>, vector<1x1x256xf32>
    %32 = vector.shape_cast %31 : vector<1x1x256xf32> to vector<1x256xf32>
    %33 = vector.shape_cast %32 : vector<1x256xf32> to vector<1x256xf32>
    %34 = vector.broadcast %33 : vector<1x256xf32> to vector<32x256xf32>
    %35 = arith.mulf %3, %22 : vector<32x256xf32>
    %36 = arith.mulf %7, %26 : vector<32x256xf32>
    %37 = arith.addf %35, %36 : vector<32x256xf32>
    %38 = arith.mulf %11, %30 : vector<32x256xf32>
    %39 = arith.addf %37, %38 : vector<32x256xf32>
    %40 = arith.mulf %15, %34 : vector<32x256xf32>
    %41 = arith.addf %39, %40 : vector<32x256xf32>
    %42 = arith.addf %41, %18 : vector<32x256xf32>
    %cst = arith.constant 0.000000e+00 : f32
    %43 = vector.broadcast %cst : f32 to vector<32x256xf32>
    %44 = arith.subf %43, %42 : vector<32x256xf32>
    %45 = math.exp %44 : vector<32x256xf32>
    %cst_22 = arith.constant 1.000000e+00 : f32
    %46 = vector.broadcast %cst_22 : f32 to vector<32x256xf32>
    %47 = arith.addf %46, %45 : vector<32x256xf32>
    %48 = tpu.reciprocal %47 : vector<32x256xf32> -> vector<32x256xf32>
    %49 = arith.mulf %42, %48 : vector<32x256xf32>
    %c0_23 = arith.constant 0 : index
    %c0_24 = arith.constant 0 : index
    %c0_25 = arith.constant 0 : index
    %50 = vector.load %arg4[%c0_23, %c0_24, %c0_25] : memref<1x32x256xf32, #tpu.memory_space<vmem>>, vector<1x32x256xf32>
    %51 = vector.shape_cast %50 : vector<1x32x256xf32> to vector<32x256xf32>
    %52 = vector.shape_cast %49 : vector<32x256xf32> to vector<1x32x256xf32>
    tpu.vector_store %arg4[%c0_23, %c0_24, %c0_25], %52 {strides = array<i32>} : memref<1x32x256xf32, #tpu.memory_space<vmem>>, vector<1x32x256xf32>,
    return
  }
  func.func @transform_0(%arg0: i32) -> (i32, i32, i32) {
    %c0_i32 = arith.constant 0 : i32
    %c0_i32_0 = arith.constant 0 : i32
    %c0_i32_1 = arith.constant 0 : i32
    return %arg0, %c0_i32, %c0_i32_0 : i32, i32, i32
  }
  func.func @transform_1(%arg0: i32) -> (i32, i32, i32) {
    %c0_i32 = arith.constant 0 : i32
    %c0_i32_0 = arith.constant 0 : i32
    %c0_i32_1 = arith.constant 0 : i32
    %c0_i32_2 = arith.constant 0 : i32
    return %c0_i32, %c0_i32_0, %c0_i32_1 : i32, i32, i32
  }
  func.func @transform_2(%arg0: i32) -> (i32, i32) {
    %c0_i32 = arith.constant 0 : i32
    %c0_i32_0 = arith.constant 0 : i32
    %c0_i32_1 = arith.constant 0 : i32
    return %c0_i32, %c0_i32_0 : i32, i32
  }
  func.func @transform_3(%arg0: i32) -> (i32, i32, i32) {
    %c0_i32 = arith.constant 0 : i32
    %c0_i32_0 = arith.constant 0 : i32
    %c0_i32_1 = arith.constant 0 : i32
    return %arg0, %c0_i32, %c0_i32_0 : i32, i32, i32
  }
}

</mosaic_0001>

<bundles_post_ra>
// kernel: tpu_custom_call.1
= control target key start
LH: loop header
LB: loop body
LE: loop exit
PB: predicated region body
PF: predicated region fallthrough
CT: control target
= control target key end

     0   :  { %8 = vsyncpa [#allocation3], 0  ;;  %s931_s0 = inlined_call_operand.vmem [shape: f32[2,4,256], index: 0, kind: input, shape index: {}]   ;;  %s932_s1 = inlined_call_operand.vmem [shape: f32[4,32,1], index: 1, kind: input, shape index: {}]   ;;  %s933_s2 = inlined_call_operand.vmem [shape: f32[32,1], index: 2, kind: input, shape index: {}]   ;;  %s934_s3 = inlined_call_operand.hbm [shape: f32[2,32,256], index: 3, kind: output, shape index: {}]  }
   0x1   :  { %10 = vsyncpa [#allocation3 + $0x1], 0  ;;  %s732_s12 = smov 0   ;;  %s734_s13 = smov 0  }
   0x2   :  { %s736_s14 = smov 0   ;;  %s738_s15 = smov 0  }
   0x3 LB: > { %s753_s16 = sadd.s32 4294967295, %s706_s15   ;;  %s539_s17 = sadd.s32 4294967294, %s706_s15   ;;  %s706_s15 = sphi %s738_s15, %s940_s15   ;;  %s702_s14 = sphi %s736_s14, %s939_s14   ;;  %s698_s13 = sphi %s734_s13, %s938_s13   ;;  %s694_s12 = sphi %s732_s12, %s937_s12  }
   0x4   : > { %s757_s18 = sadd.s32 1, %s706_s15   ;;  %s91_s19 = sadd.s32 1, %s702_s14 }
   0x5   : > { %s88_s20 = ssub.s32 %s706_s15, %s757_s18  ;;  %p101_p0 = scmp.ne.s32.totalorder %s702_s14, %s698_s13 }
   0x6   : > { %p89_p1 = scmp.eq.s32.totalorder %s88_s20, 0  ;;  %p102_p2 = scmp.eq.s32.totalorder %s753_s16, 1 }
   0x7   : > { %p107_p3 = scmp.ne.s32.totalorder %s698_s13, %s694_s12  ;;  %p108_p4 = scmp.eq.s32.totalorder %s539_s17, 1 }
   0x8   : > { %s768_s21 = scalar_select %p89_p1, %s702_s14, %s91_s19  }
   0x9   : > { %p770_p5 = por %p102_p2, %p101_p0  ;;  %p774_p6 = por %p108_p4, %p107_p3 }
   0xa   : > { %p542_p7 = scmp.ge.s32.totalorder %s706_s15, 1  ;;  %p140_p8 = scmp.lt.s32.totalorder %s706_s15, 3 }
   0xc   : > { %p141_p9 = pnand %p542_p7, %p140_p8 }
   0xd   : > { %v171_v0 = vld [vmem:[%s932_s1 + $0x10] sm:$0xff] (!%p141_p9)  ;;  %v169_v1 = vld [vmem:[%s932_s1] sm:$0xff] (!%p141_p9)  ;;  %v708_v2 = vmov (!%p141_p9), 0   ;;  %v172_v3 = vld [vmem:[%s932_s1 + $0x18] sm:$0xff] (!%p141_p9)  ;;  %p164_p10 = scmp.lt.s32.totalorder (!%p141_p9), %s753_s16, 1  ;;  %v294_v25 = vlaneseq (!%p141_p9)  ;;  %s161_s6 = sand.u32 (!%p141_p9), 1, %s698_s13  }
   0xe   : > { %144 = sbr.rel (%p141_p9) target bundleno = 229 (0xe5), region = 32  ;;  %611 = vset.pattern.permute.xlu1 (!%p141_p9), %v708_v2  ;;  %610 = vset.pattern.permute.xlu0 (!%p141_p9), %v708_v2  ;;  %v170_v4 = vld [vmem:[%s932_s1 + $0x8] sm:$0xff] (!%p141_p9)  ;;  %v546_v6 = vld [vmem:[%s932_s1 + $0x20] sm:$0xff] (!%p141_p9)  ;;  %v549_v7 = vld [vmem:[%s932_s1 + $0x38] sm:$0xff] (!%p141_p9)  ;;  %s543_s7 = sshll.u32 (!%p141_p9), %s161_s6, 6 }
   0xf   : > { %185 = vperm.xlu1 (!%p141_p9), %611, %v171_v0   ;;  %175 = vperm.xlu0 (!%p141_p9), %610, %v169_v1   ;;  %v547_v5 = vld [vmem:[%s932_s1 + $0x28] sm:$0xff] (!%p141_p9)  ;;  %v548_v8 = vld [vmem:[%s932_s1 + $0x30] sm:$0xff] (!%p141_p9)  ;;  %v550_v10 = vld [vmem:[%s932_s1 + $0x40] sm:$0xff] (!%p141_p9)  ;;  %v295_v28 = vshrl.u32 (!%p141_p9), %v294_v25, 7  ;;  %s163_s8 = scalar_lea.vmem (!%p141_p9), [#allocation2], %s543_s7  ;;  %s567_s9 = sshll.u32 (!%p141_p9), %s753_s16, 10 }
  0x10   : > { %v551_v9 = vld [vmem:[%s932_s1 + $0x48] sm:$0xff] (!%p141_p9)  ;;  %v553_v11 = vld [vmem:[%s932_s1 + $0x58] sm:$0xff] (!%p141_p9)  ;;  %v552_v12 = vld [vmem:[%s932_s1 + $0x50] sm:$0xff] (!%p141_p9)  ;;  %s477_s10 = sshll.u32 (!%p141_p9), %s163_s8, 4  ;;  %s883_s19 = scalar_lea.hbm (!%p141_p9), %s934_s3, %s567_s9  ;;  %s885_s10 = int_to_ptr.vmem [resolvable:$true] %s477_s10 }
  0x11   : > { %v555_v13 = vld [vmem:[%s932_s1 + $0x68] sm:$0xff] (!%p141_p9)  ;;  %v554_v14 = vld [vmem:[%s932_s1 + $0x60] sm:$0xff] (!%p141_p9)  ;;  %v557_v15 = vld [vmem:[%s932_s1 + $0x78] sm:$0xff] (!%p141_p9)  ;;  %v296_v31 = vsub.s32 (!%p141_p9), 0, %v295_v28  ;;  %v300_v32 = vsub.s32 (!%p141_p9), 1, %v295_v28  ;;  %s644_s20 = scalar_lea.vmem (!%p141_p9), %s885_s10, 1024 }
  0x12   : > { %v556_v16 = vld [vmem:[%s932_s1 + $0x70] sm:$0xff] (!%p141_p9)  ;;  %v269_v17 = vld [vmem:[%s933_s2 + $0x8] sm:$0xff] (!%p141_p9)  ;;  %v268_v18 = vld [vmem:[%s933_s2] sm:$0xff] (!%p141_p9)  ;;  %p645_p11 = scmp.ne.s32.totalorder (!%p141_p9), %s885_s10, %s644_s20  ;;  %s709_s24 = smov (!%p141_p9), [#allocation2]  }
  0x13   : > { %190 = vperm.xlu1 (!%p141_p9), %611, %v172_v3   ;;  %180 = vperm.xlu0 (!%p141_p9), %610, %v170_v4   ;;  %v271_v19 = vld [vmem:[%s933_s2 + $0x18] sm:$0xff] (!%p141_p9)  ;;  %v270_v20 = vld [vmem:[%s933_s2 + $0x10] sm:$0xff] (!%p141_p9)  ;;  %s648_s25 = sshll.u32 (!%p141_p9), %s709_s24, 4  ;;  %s649_s25 = int_to_ptr.vmem [resolvable:$false] %s648_s25 }
  0x14   : > { %p646_p12 = pnand (!%p141_p9), %p645_p11, %p770_p5  ;;  %s650_s26 = scalar_lea.vmem (!%p141_p9), %s649_s25, 2048 }
  0x15   : > { %s165_s28 = scalar_select %p164_p10, %s753_s16, 1 }
  0x16   : > { %s890_s16 = scalar_lea.sflag [#allocation3], %s161_s6  ;;  %p647_p13 = pneg %p646_p12 }
  0x17   : > { %205 = vperm.xlu1 %611, %v547_v5   ;;  %200 = vperm.xlu0 %610, %v546_v6   ;;  %s566_s29 = sshll.u32 %s165_s28, 3  ;;  %p651_p0 = scmp.lt.s32.totalorder %s885_s10, %s649_s25 }
  0x18   : > { %s168_s5 = scalar_lea.vmem %s931_s0, %s566_s29  ;;  %p652_p1 = scmp.lt.s32.totalorder %s650_s26, %s644_s20 }
  0x19   : > { %v558_v33 = vld [vmem:[%s168_s5 + $0x1] ss:$4 sm:$0x3]  ;;  %v292_v34 = vld [vmem:[%s168_s5] ss:$4 sm:$0x3] }
  0x1a   : > { %v310_v35 = vrot.slane %v558_v33, %v296_v31  ;;  %v559_v37 = vld [vmem:[%s168_s5 + $0x2] ss:$4 sm:$0x3]  ;;  %v297_v39 = vrot.slane %v292_v34, %v296_v31  ;;  %v301_v40 = vrot.slane %v292_v34, %v300_v32  ;;  %v560_v41 = vld [vmem:[%s168_s5 + $0x3] ss:$4 sm:$0x3]  ;;  %v314_v42 = vrot.slane %v558_v33, %v300_v32  ;;  %p653_p2 = por %p652_p1, %p651_p0 }
  0x1b   : > { %215 = vperm.xlu1 %611, %v549_v7   ;;  %210 = vperm.xlu0 %610, %v548_v8   ;;  %v323_v43 = vrot.slane %v559_v37, %v296_v31  ;;  %v327_v45 = vrot.slane %v559_v37, %v300_v32  ;;  %v336_v48 = vrot.slane %v560_v41, %v296_v31 }
  0x1c   : > { %v340_v49 = vrot.slane %v560_v41, %v300_v32  ;;  %p654_p3 = pnand %p653_p2, %p647_p13 }
  0x1f   : > { %230 = vperm.xlu1 %611, %v551_v9   ;;  %225 = vperm.xlu0 %610, %v550_v10  }
  0x23   : > { %240 = vperm.xlu1 %611, %v553_v11   ;;  %235 = vperm.xlu0 %610, %v552_v12  }
  0x27   : > { %255 = vperm.xlu1 %611, %v555_v13   ;;  %250 = vperm.xlu0 %610, %v554_v14  }
  0x2b   : > { %265 = vperm.xlu1 %611, %v557_v15   ;;  %260 = vperm.xlu0 %610, %v556_v16  }
  0x2f   : > { %279 = vperm.xlu1 %611, %v269_v17   ;;  %274 = vperm.xlu0 %610, %v268_v18  }
  0x33   : > { %289 = vperm.xlu1 %611, %v271_v19   ;;  %284 = vperm.xlu0 %610, %v270_v20  }
  0x8e   : > { %v186_v21 = vpop.permute.xlu1 %185  ;;  %v176_v22 = vpop.permute.xlu0 %175 }
  0x8f   : > { %v347_v50 = vmul.f32 %v297_v39, %v186_v21  ;;  %v348_v51 = vmul.f32 %v301_v40, %v186_v21  ;;  %v343_v52 = vmul.f32 %v297_v39, %v176_v22  ;;  %v344_v58 = vmul.f32 %v301_v40, %v176_v22 }
  0x92   : > { %v191_v23 = vpop.permute.xlu1 %190  ;;  %v181_v24 = vpop.permute.xlu0 %180 }
  0x93   : > { %v345_v53 = vmul.f32 %v297_v39, %v181_v24  ;;  %v349_v59 = vmul.f32 %v297_v39, %v191_v23  ;;  %v350_v60 = vmul.f32 %v301_v40, %v191_v23  ;;  %v346_v61 = vmul.f32 %v301_v40, %v181_v24 }
  0x96   : > { %v206_v26 = vpop.permute.xlu1 %205  ;;  %v201_v27 = vpop.permute.xlu0 %200 }
  0x97   : > { %v353_v44 = vmul.f32 %v310_v35, %v206_v26  ;;  %v354_v54 = vmul.f32 %v314_v42, %v206_v26  ;;  %v351_v55 = vmul.f32 %v310_v35, %v201_v27  ;;  %v352_v56 = vmul.f32 %v314_v42, %v201_v27 }
  0x99   : > { %v361_v62 = vadd.f32 %v353_v44, %v345_v53  ;;  %v362_v8 = vadd.f32 %v354_v54, %v346_v61  ;;  %v359_v9 = vadd.f32 %v351_v55, %v343_v52  ;;  %v360_v10 = vadd.f32 %v352_v56, %v344_v58 }
  0x9a   : > { %v216_v29 = vpop.permute.xlu1 %215  ;;  %v211_v30 = vpop.permute.xlu0 %210 }
  0x9b   : > { %v357_v57 = vmul.f32 %v310_v35, %v216_v29  ;;  %v358_v63 = vmul.f32 %v314_v42, %v216_v29  ;;  %v355_v0 = vmul.f32 %v310_v35, %v211_v30  ;;  %v356_v1 = vmul.f32 %v314_v42, %v211_v30 }
  0x9d   : > { %v365_v11 = vadd.f32 %v357_v57, %v349_v59  ;;  %v366_v16 = vadd.f32 %v358_v63, %v350_v60  ;;  %v363_v17 = vadd.f32 %v355_v0, %v347_v50  ;;  %v364_v18 = vadd.f32 %v356_v1, %v348_v51 }
  0x9e   : > { %v231_v36 = vpop.permute.xlu1 %230  ;;  %v226_v38 = vpop.permute.xlu0 %225 }
  0x9f   : > { %v369_v4 = vmul.f32 %v323_v43, %v231_v36  ;;  %v370_v5 = vmul.f32 %v327_v45, %v231_v36  ;;  %v367_v6 = vmul.f32 %v323_v43, %v226_v38  ;;  %v368_v7 = vmul.f32 %v327_v45, %v226_v38 }
  0xa1   : > { %v377_v22 = vadd.f32 %v369_v4, %v361_v62  ;;  %v378_v23 = vadd.f32 %v370_v5, %v362_v8  ;;  %v375_v24 = vadd.f32 %v367_v6, %v359_v9  ;;  %v376_v25 = vadd.f32 %v368_v7, %v360_v10 }
  0xa2   : > { %v241_v46 = vpop.permute.xlu1 %240  ;;  %v236_v47 = vpop.permute.xlu0 %235 }
  0xa3   : > { %v373_v19 = vmul.f32 %v323_v43, %v241_v46  ;;  %v374_v26 = vmul.f32 %v327_v45, %v241_v46  ;;  %v371_v27 = vmul.f32 %v323_v43, %v236_v47  ;;  %v372_v28 = vmul.f32 %v327_v45, %v236_v47 }
  0xa5   : > { %v381_v34 = vadd.f32 %v373_v19, %v365_v11  ;;  %v382_v43 = vadd.f32 %v374_v26, %v366_v16  ;;  %v379_v45 = vadd.f32 %v371_v27, %v363_v17  ;;  %v380_v46 = vadd.f32 %v372_v28, %v364_v18 }
  0xa6   : > { %v256_v2 = vpop.permute.xlu1 %255  ;;  %v251_v3 = vpop.permute.xlu0 %250 }
  0xa7   : > { %v385_v12 = vmul.f32 %v336_v48, %v256_v2  ;;  %v386_v13 = vmul.f32 %v340_v49, %v256_v2  ;;  %v383_v14 = vmul.f32 %v336_v48, %v251_v3  ;;  %v384_v15 = vmul.f32 %v340_v49, %v251_v3 }
  0xa9   : > { %v393_v30 = vadd.f32 %v385_v12, %v377_v22  ;;  %v394_v31 = vadd.f32 %v386_v13, %v378_v23  ;;  %v391_v32 = vadd.f32 %v383_v14, %v375_v24  ;;  %v392_v33 = vadd.f32 %v384_v15, %v376_v25 }
  0xaa   : > { %v266_v20 = vpop.permute.xlu1 %265  ;;  %v261_v21 = vpop.permute.xlu0 %260 }
  0xab   : > { %v389_v29 = vmul.f32 %v336_v48, %v266_v20  ;;  %v390_v35 = vmul.f32 %v340_v49, %v266_v20  ;;  %v387_v36 = vmul.f32 %v336_v48, %v261_v21  ;;  %v388_v37 = vmul.f32 %v340_v49, %v261_v21 }
  0xad   : > { %v397_v47 = vadd.f32 %v389_v29, %v381_v34  ;;  %v398_v53 = vadd.f32 %v390_v35, %v382_v43  ;;  %v395_v55 = vadd.f32 %v387_v36, %v379_v45  ;;  %v396_v56 = vadd.f32 %v388_v37, %v380_v46 }
  0xae   : > { %v280_v38 = vpop.permute.xlu1 %279  ;;  %v275_v39 = vpop.permute.xlu0 %274 }
  0xaf   : > { %v845_v40 = vadd.f32 %v393_v30, %v280_v38  ;;  %v847_v41 = vadd.f32 %v394_v31, %v280_v38  ;;  %v849_v42 = vadd.f32 %v391_v32, %v275_v39  ;;  %v851_v44 = vadd.f32 %v392_v33, %v275_v39 }
  0xb1   : > { %v409_v50 = vsub.f32 0.0, %v845_v40  ;;  %v410_v51 = vsub.f32 0.0, %v847_v41  ;;  %v407_v48 = vsub.f32 0.0, %v849_v42  ;;  %v408_v49 = vsub.f32 0.0, %v851_v44 }
  0xb2   : > { %v290_v52 = vpop.permute.xlu1 %289  ;;  %v285_v54 = vpop.permute.xlu0 %284 }
  0xb3   : > { %v419_v57 = vmul.f32 1.442695, %v409_v50  ;;  %v421_v58 = vmul.f32 1.442695, %v410_v51  ;;  %v415_v59 = vmul.f32 1.442695, %v407_v48  ;;  %v857_v60 = vadd.f32 %v397_v47, %v290_v52 }
  0xb4   : > { %v417_v61 = vmul.f32 1.442695, %v408_v49  ;;  %v859_v62 = vadd.f32 %v398_v53, %v290_v52  ;;  %v861_v63 = vadd.f32 %v395_v55, %v285_v54  ;;  %v863_v0 = vadd.f32 %v396_v56, %v285_v54 }
  0xb5   : > { %612 = vpow2.f32 %v419_v57  ;;  %v413_v1 = vsub.f32 0.0, %v857_v60 }
  0xb6   : > { %614 = vpow2.f32 %v421_v58  ;;  %v414_v2 = vsub.f32 0.0, %v859_v62  ;;  %v411_v3 = vsub.f32 0.0, %v861_v63  ;;  %v412_v4 = vsub.f32 0.0, %v863_v0 }
  0xb7   : > { %616 = vpow2.f32 %v415_v59  ;;  %v427_v5 = vmul.f32 1.442695, %v413_v1 }
  0xb8   : > { %618 = vpow2.f32 %v417_v61  ;;  %v429_v6 = vmul.f32 1.442695, %v414_v2  ;;  %v423_v7 = vmul.f32 1.442695, %v411_v3  ;;  %v425_v8 = vmul.f32 1.442695, %v412_v4 }
  0xb9   : > { %620 = vpow2.f32 %v427_v5 }
  0xba   : > { %622 = vpow2.f32 %v429_v6 }
  0xbb   : > { %624 = vpow2.f32 %v423_v7 }
  0xbc   : > { %626 = vpow2.f32 %v425_v8 }
  0xbf   : > { %v613_v9 = vpop.eup %612 }
  0xc0   : > { %v615_v10 = vpop.eup %614  ;;  %v433_v11 = vadd.f32 1.0, %v613_v9 }
  0xc1   : > { %v617_v12 = vpop.eup %616  ;;  %v434_v13 = vadd.f32 1.0, %v615_v10 }
  0xc2   : > { %v619_v14 = vpop.eup %618  ;;  %628 = vrcp.f32 %v433_v11  ;;  %v431_v15 = vadd.f32 1.0, %v617_v12 }
  0xc3   : > { %v621_v16 = vpop.eup %620  ;;  %630 = vrcp.f32 %v434_v13  ;;  %v432_v17 = vadd.f32 1.0, %v619_v14 }
  0xc4   : > { %v623_v18 = vpop.eup %622  ;;  %632 = vrcp.f32 %v431_v15  ;;  %v437_v19 = vadd.f32 1.0, %v621_v16 }
  0xc5   : > { %v625_v20 = vpop.eup %624  ;;  %634 = vrcp.f32 %v432_v17  ;;  %v438_v21 = vadd.f32 1.0, %v623_v18 }
  0xc6   : > { %v627_v22 = vpop.eup %626  ;;  %636 = vrcp.f32 %v437_v19  ;;  %v435_v23 = vadd.f32 1.0, %v625_v20 }
  0xc7   : > { %638 = vrcp.f32 %v438_v21  ;;  %v436_v24 = vadd.f32 1.0, %v627_v22 }
  0xc8   : > { %640 = vrcp.f32 %v435_v23 }
  0xc9   : > { %642 = vrcp.f32 %v436_v24 }
  0xcc   : > { %v629_v25 = vpop.eup %628 }
  0xcd   : > { %v631_v26 = vpop.eup %630  ;;  %v449_v27 = vmul.f32 %v629_v25, %v845_v40 }
  0xce   : > { %v633_v28 = vpop.eup %632  ;;  %v450_v29 = vmul.f32 %v631_v26, %v847_v41 }
  0xcf   : > { %v635_v30 = vpop.eup %634  ;;  %457 = vst [vmem:[%s163_s8 + $0x10] sm:$0xff] %v449_v27  ;;  %v447_v31 = vmul.f32 %v633_v28, %v849_v42 }
  0xd0   : > { %v637_v32 = vpop.eup %636  ;;  %458 = vst [vmem:[%s163_s8 + $0x18] sm:$0xff] %v450_v29  ;;  %v448_v33 = vmul.f32 %v635_v30, %v851_v44 }
  0xd1   : > { %v639_v34 = vpop.eup %638  ;;  %455 = vst [vmem:[%s163_s8] sm:$0xff] %v447_v31  ;;  %v453_v35 = vmul.f32 %v637_v32, %v857_v60 }
  0xd2   : > { %v641_v36 = vpop.eup %640  ;;  %456 = vst [vmem:[%s163_s8 + $0x8] sm:$0xff] %v448_v33  ;;  %v454_v37 = vmul.f32 %v639_v34, %v859_v62 }
  0xd3   : > { %v643_v38 = vpop.eup %642  ;;  %461 = vst [vmem:[%s163_s8 + $0x30] sm:$0xff] %v453_v35  ;;  %v451_v39 = vmul.f32 %v641_v36, %v861_v63 }
  0xd4   : > { %462 = vst [vmem:[%s163_s8 + $0x38] sm:$0xff] %v454_v37  ;;  %v452_v40 = vmul.f32 %v643_v38, %v863_v0 }
  0xd5   : > { %459 = vst [vmem:[%s163_s8 + $0x20] sm:$0xff] %v451_v39 }
  0xd6   : > { %460 = vst [vmem:[%s163_s8 + $0x28] sm:$0xff] %v452_v40 }
  0xd7   : > { %657 = shalt.err (!%p654_p3)
}
  0xd8   : > { %s658_s27 = scalar_lea.hbm %s883_s19, 1024  ;;  %s662_s30 = scalar_lea.hbm %s934_s3, 2048 }
  0xd9   : > { %p659_p4 = scmp.ne.s32.totalorder %s883_s19, %s658_s27  ;;  %p663_p9 = scmp.lt.u32.totalorder %s883_s19, %s934_s3 }
  0xda   : > { %p664_p10 = scmp.lt.u32.totalorder %s662_s30, %s658_s27  ;;  %p666_p12 = scmp.lt.u32.totalorder %s658_s27, %s883_s19 }
  0xdb   : > { %p660_p7 = pnand %p659_p4, %p770_p5 }
  0xdc   : > { %p665_p11 = por %p664_p10, %p663_p9 }
  0xdd   : > { %p661_p8 = pneg %p660_p7 }
  0xde   : > { %p667_p13 = por %p666_p12, %p665_p11 }
  0xe0   : > { %p668_p0 = pnand %p667_p13, %p661_p8 }
  0xe2   : > { %671 = shalt.err (!%p668_p0)
}
  0xe3   : > { %s710_s6 = smov 256   ;;  %s711_s7 = smov 16  }
  0xe4   : > { %568 = dma.vmem_to_hbm [thread:$0]  (%p770_p5), %s885_s10, 1024, %s883_s19, %s890_s16, %s710_s6, %s710_s6, %s711_s7  }
  0xe5 PF: > { %p574_p1 = scmp.ge.s32.totalorder %s706_s15, 2  ;;  %s492_s8 = sand.u32 1, %s694_s12  }
  0xe6   : > { %s493_s9 = scalar_lea.sflag [#allocation3], %s492_s8 }
  0xe7   : > { %p571_p2 = pnand %p574_p1, %p774_p6 }
  0xe9   : > { %689 = dma.done.wait (!%p571_p2), %s493_s9, 1024  }
  0xea   : > { %691 = vsyncadd (!%p571_p2), %s493_s9, 4294966272  ;;  %p13_p3 = scmp.ge.s32.totalorder %s757_s18, 4   ;;  %s937_s12 = smov %s698_s13 }
  0xeb   : > { %s938_s13 = smov %s702_s14  ;;  %s939_s14 = smov %s768_s21 }
  0xec   : > { %s940_s15 = smov %s757_s18  ;;  %15 = sbr.rel (!%p13_p3) target bundleno = 3 (0x3), region = 73 }
  0xf3   :  { %498 = vsyncpa [#allocation3], 1 }
  0xf4   :  { %500 = vsyncpa [#allocation3 + $0x1], 1 }

</bundles_post_ra>
